<compile_context>
chip_gen: v5e
topology: v5e:2x2
jax: 0.10.0
libtpu: 0.0.40
codegen_flags: <defaults>
</compile_context>

<pallas_src>
import math
import functools

import jax
import jax.numpy as jnp
import numpy as np
from jax.experimental import pallas as pl
from jax.experimental.pallas import tpu as pltpu

_HP = jax.lax.Precision.HIGHEST          # reference only
_SQRT_HALF = 1.0 / math.sqrt(2.0)
_LN_EPS = 1e-5                           # torch.nn.LayerNorm default


def _erf_approx(x):
    # Abramowitz & Stegun 7.1.26, |err| < 1.5e-7 (float32-level accuracy).
    # TODO(synk): switch to lax.erf once Mosaic guarantees an erf lowering.
    a1, a2, a3, a4, a5 = (0.254829592, -0.284496736, 1.421413741,
                          -1.453152027, 1.061405429)
    p = 0.3275911
    sgn = jnp.where(x >= 0.0, 1.0, -1.0)
    ax = jnp.abs(x)
    t = 1.0 / (1.0 + p * ax)
    poly = ((((a5 * t + a4) * t + a3) * t + a2) * t + a1) * t
    return sgn * (1.0 - poly * jnp.exp(-ax * ax))


def _gelu_exact(x):
    # torch F.gelu default:  0.5 * x * (1 + erf(x / sqrt(2)))
    return 0.5 * x * (1.0 + _erf_approx(x * _SQRT_HALF))


def _layer_norm(x, gamma, beta, eps):
    mu = jnp.mean(x, axis=-1, keepdims=True)
    d = x - mu
    var = jnp.mean(d * d, axis=-1, keepdims=True)
    return d * jax.lax.rsqrt(var + eps) * gamma + beta


def _rel_shift(bd):
    """Transformer-XL rel_shift, computed entirely in VMEM.

    bd: (T, P) with P = 2T-1.  Returns (T, T) with
        out[i, j] = bd[i, j + (T-1) - i]
    (identical to the torch pad/reshape/slice trick).  Implemented as a
    ceil(log2(T))-stage barrel shifter of per-row left-rolls built from static
    lane slices + concat + select, so the quadratic score tensor never
    round-trips HBM and no dynamic lane indexing is needed.
    """
    T, P = bd.shape
    row = jax.lax.broadcasted_iota(jnp.int32, (T, 1), 0)
    shift = (T - 1) - row                # per-row left-roll amount in [0, T-1]
    x = bd
    c = 1
    while c < T:                         # static Python loop
        rolled = jnp.concatenate([x[:, c:], x[:, :c]], axis=1)   # left-roll by c
        x = jnp.where((shift & c) != 0, rolled, x)
        c *= 2
    return x[:, :T]


# ----------------------------------------------------------------------------
# Kernel 1: fused per-(batch, head) relative-position attention
# ----------------------------------------------------------------------------
def _fused_attention_kernel(x_ref, pos_ref,
                            wq_ref, bq_ref, wk_ref, bk_ref, wv_ref, bv_ref,
                            wp_ref, pbu_ref, pbv_ref, mask_ref,
                            ctx_ref, *, inv_sqrt_dk):
    x = x_ref[0]            # (T, H)  bf16
    pos = pos_ref[...]      # (P, H)  bf16

    # Per-head projections: bf16 operands, f32 accumulation on the MXU.
    q = jnp.dot(x, wq_ref[0], preferred_element_type=jnp.float32) + bq_ref[0]
    k = jnp.dot(x, wk_ref[0], preferred_element_type=jnp.float32) + bk_ref[0]
    v = jnp.dot(x, wv_ref[0], preferred_element_type=jnp.float32) + bv_ref[0]
    p = jnp.dot(pos, wp_ref[0], preferred_element_type=jnp.float32)  # no bias

    # Fold 1/sqrt(dk) into q so the (T,T)/(T,P) score tensors need no rescale.
    q_u = ((q + pbu_ref[0]) * inv_sqrt_dk).astype(jnp.bfloat16)      # (T, dk)
    q_v = ((q + pbv_ref[0]) * inv_sqrt_dk).astype(jnp.bfloat16)
    k_b = k.astype(jnp.bfloat16)
    v_b = v.astype(jnp.bfloat16)
    p_b = p.astype(jnp.bfloat16)

    # matrix_ac = (q+u) k^T ; matrix_bd = rel_shift((q+v) p^T)  -- all in VMEM.
    ac = jax.lax.dot_general(q_u, k_b, (((1,), (1,)), ((), ())),
                             preferred_element_type=jnp.float32)       # (T, T)
    bd = jax.lax.dot_general(q_v, p_b, (((1,), (1,)), ((), ())),
                             preferred_element_type=jnp.float32)       # (T, P)
    scores = ac + _rel_shift(bd)                                       # f32

    neg = mask_ref[0] > 0.5             # (1, T) key-padding mask, hoisted once
    scores = jnp.where(neg, -10000.0, scores)
    m = jnp.max(scores, axis=-1, keepdims=True)
    e = jnp.exp(scores - m)
    s = jnp.sum(e, axis=-1, keepdims=True)
    attn = e * pl.reciprocal(s, approx=True)     # EUP reciprocal, no VALU divide
    attn = jnp.where(neg, 0.0, attn)             # attention dropout: identity

    ctx = jnp.dot(attn.astype(jnp.bfloat16), v_b,
                  preferred_element_type=jnp.float32)                  # (T, dk)
    ctx_ref[0, 0] = ctx.astype(jnp.bfloat16)


# ----------------------------------------------------------------------------
# Kernel 2: out proj + residual + LN, GELU FFN, residual + LN
# ----------------------------------------------------------------------------
def _out_ffn_kernel(x_ref, ctx_ref,
                    wo_ref, bo_ref, g1_ref, be1_ref,
                    w1_ref, b1_ref, w2_ref, b2_ref, g2_ref, be2_ref,
                    o_ref, *, eps):
    x = x_ref[0]            # (tq, H)  f32 residual stream
    ctx = ctx_ref[0]        # (tq, H)  bf16 attention context

    # linear_out + dropout(identity) + residual + LayerNorm   (BertAttention)
    attn_out = jnp.dot(ctx, wo_ref[...],
                       preferred_element_type=jnp.float32) + bo_ref[...]
    x1 = _layer_norm(attn_out + x, g1_ref[...], be1_ref[...], eps)

    # BertIntermediate: dense -> exact GELU
    h1 = jnp.dot(x1.astype(jnp.bfloat16), w1_ref[...],
                 preferred_element_type=jnp.float32) + b1_ref[...]
    h1 = _gelu_exact(h1)

    # BertOutput: dense -> dropout(identity) -> LayerNorm(h + x1)
    h2 = jnp.dot(h1.astype(jnp.bfloat16), w2_ref[...],
                 preferred_element_type=jnp.float32) + b2_ref[...]
    o_ref[0] = _layer_norm(h2 + x1, g2_ref[...], be2_ref[...], eps)


# ----------------------------------------------------------------------------
# Wrapper
# ----------------------------------------------------------------------------
def bert_layer_forward(params, hidden_states, attention_mask, pos_emb):
    B, T, H = hidden_states.shape
    nh = params["nh"]
    dk = H // nh
    P = pos_emb.shape[1]
    I = 4 * H
    bf = jnp.bfloat16

    # --- layout plumbing (linear-size, handled by XLA outside the kernels) ---
    x_bf = hidden_states.astype(bf)
    pos_bf = pos_emb.reshape(P, H).astype(bf)

    def head_w(w_t):   # (H, H) -> (nh, H, dk): head-major so the lane dim is dk
        return w_t.reshape(H, nh, dk).transpose(1, 0, 2).astype(bf)

    def head_b(b):     # (1, H) -> (nh, 1, dk), f32 (added after f32 accumulation)
        return b.reshape(nh, dk)[:, None, :]

    wq_h = head_w(params["wq_t"])
    wk_h = head_w(params["wk_t"])
    wv_h = head_w(params["wv_t"])
    wp_h = head_w(params["wp_t"])
    bq_h = head_b(params["bq"])
    bk_h = head_b(params["bk"])
    bv_h = head_b(params["bv"])
    pbu = params["pos_bias_u"][:, None, :]        # (nh, 1, dk) f32
    pbv = params["pos_bias_v"][:, None, :]

    # --- Kernel 1: fused rel-pos attention, grid over (batch, head) ----------
    flops1 = 2 * B * nh * dk * (3 * T * H + P * H + 2 * T * T + T * P)
    bytes1 = 2 * (B * T * H + P * H + 4 * H * H + B * T * H) + 4 * (5 * H + B * T)
    ctx = pl.pallas_call(
        functools.partial(_fused_attention_kernel,
                          inv_sqrt_dk=1.0 / math.sqrt(dk)),
        grid=(B, nh),
        in_specs=[
            pl.BlockSpec((1, T, H), lambda b, h: (b, 0, 0)),      # x (bf16)
            pl.BlockSpec((P, H), lambda b, h: (0, 0)),            # pos emb (bf16)
            pl.BlockSpec((1, H, dk), lambda b, h: (h, 0, 0)),     # Wq[h]
            pl.BlockSpec((1, 1, dk), lambda b, h: (h, 0, 0)),     # bq[h]
            pl.BlockSpec((1, H, dk), lambda b, h: (h, 0, 0)),     # Wk[h]
            pl.BlockSpec((1, 1, dk), lambda b, h: (h, 0, 0)),     # bk[h]
            pl.BlockSpec((1, H, dk), lambda b, h: (h, 0, 0)),     # Wv[h]
            pl.BlockSpec((1, 1, dk), lambda b, h: (h, 0, 0)),     # bv[h]
            pl.BlockSpec((1, H, dk), lambda b, h: (h, 0, 0)),     # Wpos[h] (no bias)
            pl.BlockSpec((1, 1, dk), lambda b, h: (h, 0, 0)),     # pos_bias_u[h]
            pl.BlockSpec((1, 1, dk), lambda b, h: (h, 0, 0)),     # pos_bias_v[h]
            pl.BlockSpec((1, 1, T), lambda b, h: (b, 0, 0)),      # key-padding mask
        ],
        out_specs=pl.BlockSpec((1, 1, T, dk), lambda b, h: (b, h, 0, 0)),
        out_shape=jax.ShapeDtypeStruct((B, nh, T, dk), bf),
        compiler_params=pltpu.CompilerParams(
            dimension_semantics=("parallel", "parallel"),
            vmem_limit_bytes=64 * 1024 * 1024),
        cost_estimate=pl.CostEstimate(flops=flops1,
                                      transcendentals=B * nh * T * T,
                                      bytes_accessed=bytes1),
    )(x_bf, pos_bf, wq_h, bq_h, wk_h, bk_h, wv_h, bv_h, wp_h, pbu, pbv,
      attention_mask)

    # head-major (B, nh, T, dk) -> (B, T, H), bf16 (linear-size transpose)
    ctx_bth = ctx.transpose(0, 2, 1, 3).reshape(B, T, H)

    # --- Kernel 2: out proj + LN + FFN + LN, grid over (batch, query tiles) --
    tq = 256 if (T % 256 == 0) else T      # query tile; weights stay resident
    flops2 = 2 * B * T * (H * H + 2 * H * I)
    bytes2 = 4 * 2 * B * T * H + 2 * (B * T * H + H * H + 2 * H * I) + 4 * (7 * H + I)
    out = pl.pallas_call(
        functools.partial(_out_ffn_kernel, eps=_LN_EPS),
        grid=(B, T // tq),
        in_specs=[
            pl.BlockSpec((1, tq, H), lambda b, t: (b, t, 0)),     # residual x (f32)
            pl.BlockSpec((1, tq, H), lambda b, t: (b, t, 0)),     # context (bf16)
            pl.BlockSpec((H, H), lambda b, t: (0, 0)),            # Wo
            pl.BlockSpec((1, H), lambda b, t: (0, 0)),            # bo
            pl.BlockSpec((1, H), lambda b, t: (0, 0)),            # LN1 gamma
            pl.BlockSpec((1, H), lambda b, t: (0, 0)),            # LN1 beta
            pl.BlockSpec((H, I), lambda b, t: (0, 0)),            # W1
            pl.BlockSpec((1, I), lambda b, t: (0, 0)),            # b1
            pl.BlockSpec((I, H), lambda b, t: (0, 0)),            # W2
            pl.BlockSpec((1, H), lambda b, t: (0, 0)),            # b2
            pl.BlockSpec((1, H), lambda b, t: (0, 0)),            # LN2 gamma
            pl.BlockSpec((1, H), lambda b, t: (0, 0)),            # LN2 beta
        ],
        out_specs=pl.BlockSpec((1, tq, H), lambda b, t: (b, t, 0)),
        out_shape=jax.ShapeDtypeStruct((B, T, H), jnp.float32),
        compiler_params=pltpu.CompilerParams(
            dimension_semantics=("parallel", "parallel"),
            vmem_limit_bytes=64 * 1024 * 1024),
        cost_estimate=pl.CostEstimate(flops=flops2,
                                      transcendentals=B * T * I,
                                      bytes_accessed=bytes2),
    )(hidden_states, ctx_bth,
      params["wo_t"].astype(bf), params["bo"], params["ln1_g"], params["ln1_b"],
      params["w1_t"].astype(bf), params["b1"],
      params["w2_t"].astype(bf), params["b2"],
      params["ln2_g"], params["ln2_b"])
    return out


# ----------------------------------------------------------------------------
# Pure-JAX reference (mirrors the PyTorch module math) for a sanity check
# ----------------------------------------------------------------------------
def bert_layer_reference(params, x, mask, pos_emb):
    B, T, H = x.shape
    nh = params["nh"]
    dk = H // nh

    def lin(v, w_t, b=None):
        y = jnp.dot(v, w_t, precision=_HP)
        return y + b if b is not None else y

    q = lin(x, params["wq_t"], params["bq"])
    k = lin(x, params["wk_t"], params["bk"])
    v = lin(x, params["wv_t"], params["bv"])
    p = lin(pos_emb, params["wp_t"])

    qh = q.reshape(B, T, nh, dk)
    kh = k.reshape(B, T, nh, dk).transpose(0, 2, 1, 3)
    vh = v.reshape(B, T, nh, dk).transpose(0, 2, 1, 3)
    ph = p.reshape(1, -1, nh, dk).transpose(0, 2, 1, 3)[0]       # (nh, P, dk)

    q_u = (qh + params["pos_bias_u"]).transpose(0, 2, 1, 3)
    q_v = (qh + params["pos_bias_v"]).transpose(0, 2, 1, 3)

    ac = jnp.einsum("bhid,bhjd->bhij", q_u, kh, precision=_HP)
    bd = jnp.einsum("bhid,hjd->bhij", q_v, ph, precision=_HP)
    P = bd.shape[-1]
    bd = jnp.pad(bd, ((0, 0), (0, 0), (0, 0), (1, 0)))
    bd = bd.reshape(B, nh, P + 1, T)[:, :, 1:, :].reshape(B, nh, T, P)[..., :T]

    scores = (ac + bd) / math.sqrt(dk)
    m = mask[:, None]                                            # (B,1,1,T)
    scores = jnp.where(m > 0.5, -10000.0, scores)
    attn = jax.nn.softmax(scores, axis=-1)
    attn = jnp.where(m > 0.5, 0.0, attn)
    ctx = jnp.einsum("bhij,bhjd->bhid", attn, vh, precision=_HP)
    ctx = ctx.transpose(0, 2, 1, 3).reshape(B, T, H)
    attn_out = lin(ctx, params["wo_t"], params["bo"])

    def ln(z, g, b):
        mu = jnp.mean(z, -1, keepdims=True)
        var = jnp.mean((z - mu) ** 2, -1, keepdims=True)
        return (z - mu) / jnp.sqrt(var + _LN_EPS) * g + b

    x1 = ln(attn_out + x, params["ln1_g"], params["ln1_b"])
    h1 = jax.nn.gelu(lin(x1, params["w1_t"], params["b1"]), approximate=False)
    h2 = lin(h1, params["w2_t"], params["b2"])
    return ln(h2 + x1, params["ln2_g"], params["ln2_b"])


# ----------------------------------------------------------------------------
# Deterministic parameter init (shapes follow the module __init__)
# ----------------------------------------------------------------------------
def init_params(key, hidden, nh):
    dk = hidden // nh
    inter = 4 * hidden
    keys = jax.random.split(key, 20)

    def linear(kw, kb, fan_in, fan_out):
        bound = 1.0 / math.sqrt(fan_in)
        w = jax.random.uniform(kw, (fan_out, fan_in), jnp.float32, -bound, bound)
        b = jax.random.uniform(kb, (fan_out,), jnp.float32, -bound, bound)
        return w, b

    wq, bq = linear(keys[0], keys[1], hidden, hidden)
    wk, bk = linear(keys[2], keys[3], hidden, hidden)
    wv, bv = linear(keys[4], keys[5], hidden, hidden)
    wp, _ = linear(keys[6], keys[7], hidden, hidden)             # linear_pos: no bias
    wo, bo = linear(keys[8], keys[9], hidden, hidden)
    w1, b1 = linear(keys[10], keys[11], hidden, inter)
    w2, b2 = linear(keys[12], keys[13], inter, hidden)
    pbu = 0.1 * jax.random.normal(keys[14], (nh, dk), jnp.float32)
    pbv = 0.1 * jax.random.normal(keys[15], (nh, dk), jnp.float32)

    return dict(
        nh=nh,
        wq_t=wq.T, bq=bq.reshape(1, hidden),
        wk_t=wk.T, bk=bk.reshape(1, hidden),
        wv_t=wv.T, bv=bv.reshape(1, hidden),
        wp_t=wp.T,
        wo_t=wo.T, bo=bo.reshape(1, hidden),
        w1_t=w1.T, b1=b1.reshape(1, inter),
        w2_t=w2.T, b2=b2.reshape(1, hidden),
        ln1_g=(1.0 + 0.05 * jax.random.normal(keys[16], (1, hidden))).astype(jnp.float32),
        ln1_b=(0.05 * jax.random.normal(keys[17], (1, hidden))).astype(jnp.float32),
        ln2_g=(1.0 + 0.05 * jax.random.normal(keys[18], (1, hidden))).astype(jnp.float32),
        ln2_b=(0.05 * jax.random.normal(keys[19], (1, hidden))).astype(jnp.float32),
        pos_bias_u=pbu, pos_bias_v=pbv,
    )


if __name__ == "__main__":
    B, T, H, NH = 2, 8, 32, 4
    key = jax.random.PRNGKey(0)
    kp, kx, kpos = jax.random.split(key, 3)

    params = init_params(kp, H, NH)
    hidden_states = 0.5 * jax.random.normal(kx, (B, T, H), jnp.float32)
    pos_emb = 0.5 * jax.random.normal(kpos, (1, 2 * T - 1, H), jnp.float32)
    # key-padding mask: 1.0 == masked (matches torch bool mask / masked_fill)
    lengths = jnp.array([T, T - 2])
    attention_mask = (jnp.arange(T)[None, :] >= lengths[:, None]
                      ).astype(jnp.float32)[:, None, :]          # (B, 1, T)

    out = bert_layer_forward(params, hidden_states, attention_mask, pos_emb)
    out = jax.block_until_ready(out)

    ref = bert_layer_reference(params, hidden_states, attention_mask, pos_emb)
    # Tolerance widened vs. a pure-f32 version because matmuls use bf16
    # operands (f32 accumulation); softmax / LayerNorm stay in f32.
    np.testing.assert_allclose(np.asarray(out), np.asarray(ref),
                               rtol=3e-2, atol=3e-2)
    print("KERNEL_OK")
</pallas_src>

<mosaic_0001>
module attributes {stable_mosaic.version = 11 : i64} {
  func.func @_fused_attention_kernel(%arg0: i32, %arg1: i32, %arg2: memref<1x8x32xbf16, #tpu.memory_space<vmem>>, %arg3: memref<15x32xbf16, #tpu.memory_space<vmem>>, %arg4: memref<1x32x8xbf16, #tpu.memory_space<vmem>>, %arg5: memref<1x1x8xf32, #tpu.memory_space<vmem>>, %arg6: memref<1x32x8xbf16, #tpu.memory_space<vmem>>, %arg7: memref<1x1x8xf32, #tpu.memory_space<vmem>>, %arg8: memref<1x32x8xbf16, #tpu.memory_space<vmem>>, %arg9: memref<1x1x8xf32, #tpu.memory_space<vmem>>, %arg10: memref<1x32x8xbf16, #tpu.memory_space<vmem>>, %arg11: memref<1x1x8xf32, #tpu.memory_space<vmem>>, %arg12: memref<1x1x8xf32, #tpu.memory_space<vmem>>, %arg13: memref<1x1x8xf32, #tpu.memory_space<vmem>>, %arg14: memref<1x1x8x8xbf16, #tpu.memory_space<vmem>>) attributes {dimension_semantics = [#tpu.dimension_semantics<parallel>, #tpu.dimension_semantics<parallel>], iteration_bounds = array<i64: 2, 4>, scalar_prefetch = 0 : i64, scratch_operands = 0 : i64, tpu.core_type = #tpu.core_type<tc>, window_params = [{transform_indices = @transform_0, window_bounds = array<i64: 1, 8, 32>}, {pipeline_mode = #tpu.pipeline_mode<synchronous>, transform_indices = @transform_1, window_bounds = array<i64: 15, 32>}, {transform_indices = @transform_2, window_bounds = array<i64: 1, 32, 8>}, {transform_indices = @transform_3, window_bounds = array<i64: 1, 1, 8>}, {transform_indices = @transform_4, window_bounds = array<i64: 1, 32, 8>}, {transform_indices = @transform_5, window_bounds = array<i64: 1, 1, 8>}, {transform_indices = @transform_6, window_bounds = array<i64: 1, 32, 8>}, {transform_indices = @transform_7, window_bounds = array<i64: 1, 1, 8>}, {transform_indices = @transform_8, window_bounds = array<i64: 1, 32, 8>}, {transform_indices = @transform_9, window_bounds = array<i64: 1, 1, 8>}, {transform_indices = @transform_10, window_bounds = array<i64: 1, 1, 8>}, {transform_indices = @transform_11, window_bounds = array<i64: 1, 1, 8>}, {transform_indices = @transform_12, window_bounds = array<i64: 1, 1, 8, 8>}]} {
    %c0 = arith.constant 0 : index
    %c0_0 = arith.constant 0 : index
    %c0_1 = arith.constant 0 : index
    %0 = vector.load %arg2[%c0, %c0_0, %c0_1] : memref<1x8x32xbf16, #tpu.memory_space<vmem>>, vector<1x8x32xbf16>
    %1 = vector.shape_cast %0 : vector<1x8x32xbf16> to vector<8x32xbf16>
    %c0_2 = arith.constant 0 : index
    %c0_3 = arith.constant 0 : index
    %2 = vector.load %arg3[%c0_2, %c0_3] : memref<15x32xbf16, #tpu.memory_space<vmem>>, vector<15x32xbf16>
    %c0_4 = arith.constant 0 : index
    %c0_5 = arith.constant 0 : index
    %c0_6 = arith.constant 0 : index
    %3 = vector.load %arg4[%c0_4, %c0_5, %c0_6] : memref<1x32x8xbf16, #tpu.memory_space<vmem>>, vector<1x32x8xbf16>
    %4 = vector.shape_cast %3 : vector<1x32x8xbf16> to vector<32x8xbf16>
    %cst = arith.constant dense<0.000000e+00> : vector<8x8xf32>
    %5 = tpu.matmul %1, %4, %cst {dimension_numbers = #tpu.dot_dimension_numbers<[1], [0], [0], [1], [0, 0, 1, 1], [], []>} : vector<8x32xbf16>, vector<32x8xbf16>, vector<8x8xf32> -> vector<8x8xf32>
    %c0_7 = arith.constant 0 : index
    %c0_8 = arith.constant 0 : index
    %c0_9 = arith.constant 0 : index
    %6 = vector.load %arg5[%c0_7, %c0_8, %c0_9] : memref<1x1x8xf32, #tpu.memory_space<vmem>>, vector<1x1x8xf32>
    %7 = vector.shape_cast %6 : vector<1x1x8xf32> to vector<1x8xf32>
    %8 = vector.broadcast %7 : vector<1x8xf32> to vector<8x8xf32>
    %9 = arith.addf %5, %8 : vector<8x8xf32>
    %c0_10 = arith.constant 0 : index
    %c0_11 = arith.constant 0 : index
    %c0_12 = arith.constant 0 : index
    %10 = vector.load %arg6[%c0_10, %c0_11, %c0_12] : memref<1x32x8xbf16, #tpu.memory_space<vmem>>, vector<1x32x8xbf16>
    %11 = vector.shape_cast %10 : vector<1x32x8xbf16> to vector<32x8xbf16>
    %cst_13 = arith.constant dense<0.000000e+00> : vector<8x8xf32>
    %12 = tpu.matmul %1, %11, %cst_13 {dimension_numbers = #tpu.dot_dimension_numbers<[1], [0], [0], [1], [0, 0, 1, 1], [], []>} : vector<8x32xbf16>, vector<32x8xbf16>, vector<8x8xf32> -> vector<8x8xf32>
    %c0_14 = arith.constant 0 : index
    %c0_15 = arith.constant 0 : index
    %c0_16 = arith.constant 0 : index
    %13 = vector.load %arg7[%c0_14, %c0_15, %c0_16] : memref<1x1x8xf32, #tpu.memory_space<vmem>>, vector<1x1x8xf32>
    %14 = vector.shape_cast %13 : vector<1x1x8xf32> to vector<1x8xf32>
    %15 = vector.broadcast %14 : vector<1x8xf32> to vector<8x8xf32>
    %16 = arith.addf %12, %15 : vector<8x8xf32>
    %c0_17 = arith.constant 0 : index
    %c0_18 = arith.constant 0 : index
    %c0_19 = arith.constant 0 : index
    %17 = vector.load %arg8[%c0_17, %c0_18, %c0_19] : memref<1x32x8xbf16, #tpu.memory_space<vmem>>, vector<1x32x8xbf16>
    %18 = vector.shape_cast %17 : vector<1x32x8xbf16> to vector<32x8xbf16>
    %cst_20 = arith.constant dense<0.000000e+00> : vector<8x8xf32>
    %19 = tpu.matmul %1, %18, %cst_20 {dimension_numbers = #tpu.dot_dimension_numbers<[1], [0], [0], [1], [0, 0, 1, 1], [], []>} : vector<8x32xbf16>, vector<32x8xbf16>, vector<8x8xf32> -> vector<8x8xf32>
    %c0_21 = arith.constant 0 : index
    %c0_22 = arith.constant 0 : index
    %c0_23 = arith.constant 0 : index
    %20 = vector.load %arg9[%c0_21, %c0_22, %c0_23] : memref<1x1x8xf32, #tpu.memory_space<vmem>>, vector<1x1x8xf32>
    %21 = vector.shape_cast %20 : vector<1x1x8xf32> to vector<1x8xf32>
    %22 = vector.broadcast %21 : vector<1x8xf32> to vector<8x8xf32>
    %23 = arith.addf %19, %22 : vector<8x8xf32>
    %c0_24 = arith.constant 0 : index
    %c0_25 = arith.constant 0 : index
    %c0_26 = arith.constant 0 : index
    %24 = vector.load %arg10[%c0_24, %c0_25, %c0_26] : memref<1x32x8xbf16, #tpu.memory_space<vmem>>, vector<1x32x8xbf16>
    %25 = vector.shape_cast %24 : vector<1x32x8xbf16> to vector<32x8xbf16>
    %cst_27 = arith.constant dense<0.000000e+00> : vector<15x8xf32>
    %26 = tpu.matmul %2, %25, %cst_27 {dimension_numbers = #tpu.dot_dimension_numbers<[1], [0], [0], [1], [0, 0, 1, 1], [], []>} : vector<15x32xbf16>, vector<32x8xbf16>, vector<15x8xf32> -> vector<15x8xf32>
    %c0_28 = arith.constant 0 : index
    %c0_29 = arith.constant 0 : index
    %c0_30 = arith.constant 0 : index
    %27 = vector.load %arg11[%c0_28, %c0_29, %c0_30] : memref<1x1x8xf32, #tpu.memory_space<vmem>>, vector<1x1x8xf32>
    %28 = vector.shape_cast %27 : vector<1x1x8xf32> to vector<1x8xf32>
    %29 = vector.broadcast %28 : vector<1x8xf32> to vector<8x8xf32>
    %30 = arith.addf %9, %29 : vector<8x8xf32>
    %cst_31 = arith.constant 0.353553385 : f32
    %31 = vector.broadcast %cst_31 : f32 to vector<8x8xf32>
    %32 = arith.mulf %30, %31 : vector<8x8xf32>
    %33 = arith.truncf %32 : vector<8x8xf32> to vector<8x8xbf16>
    %c0_32 = arith.constant 0 : index
    %c0_33 = arith.constant 0 : index
    %c0_34 = arith.constant 0 : index
    %34 = vector.load %arg12[%c0_32, %c0_33, %c0_34] : memref<1x1x8xf32, #tpu.memory_space<vmem>>, vector<1x1x8xf32>
    %35 = vector.shape_cast %34 : vector<1x1x8xf32> to vector<1x8xf32>
    %36 = vector.broadcast %35 : vector<1x8xf32> to vector<8x8xf32>
    %37 = arith.addf %9, %36 : vector<8x8xf32>
    %cst_35 = arith.constant 0.353553385 : f32
    %38 = vector.broadcast %cst_35 : f32 to vector<8x8xf32>
    %39 = arith.mulf %37, %38 : vector<8x8xf32>
    %40 = arith.truncf %39 : vector<8x8xf32> to vector<8x8xbf16>
    %41 = arith.truncf %16 : vector<8x8xf32> to vector<8x8xbf16>
    %42 = arith.truncf %23 : vector<8x8xf32> to vector<8x8xbf16>
    %43 = arith.truncf %26 : vector<15x8xf32> to vector<15x8xbf16>
    %cst_36 = arith.constant dense<0.000000e+00> : vector<8x8xf32>
    %44 = tpu.matmul %33, %41, %cst_36 {dimension_numbers = #tpu.dot_dimension_numbers<[1], [1], [0], [0], [0, 0, 1, 0], [], []>} : vector<8x8xbf16>, vector<8x8xbf16>, vector<8x8xf32> -> vector<8x8xf32>
    %cst_37 = arith.constant dense<0.000000e+00> : vector<8x15xf32>
    %45 = tpu.matmul %40, %43, %cst_37 {dimension_numbers = #tpu.dot_dimension_numbers<[1], [1], [0], [0], [0, 0, 1, 0], [], []>} : vector<8x8xbf16>, vector<15x8xbf16>, vector<8x15xf32> -> vector<8x15xf32>
    %46 = tpu.iota {dimensions = array<i32: 0>} : vector<8x1xi32>
    %c7_i32 = arith.constant 7 : i32
    %47 = vector.broadcast %c7_i32 : i32 to vector<8x1xi32>
    %48 = arith.subi %47, %46 : vector<8x1xi32>
    %49 = vector.extract_strided_slice %45 {offsets = [0, 1], sizes = [8, 14], strides = [1, 1]} : vector<8x15xf32> to vector<8x14xf32>
    %50 = vector.extract_strided_slice %45 {offsets = [0, 0], sizes = [8, 1], strides = [1, 1]} : vector<8x15xf32> to vector<8x1xf32>
    %51 = tpu.concatenate %49, %50 in 1 : vector<8x14xf32>, vector<8x1xf32> -> vector<8x15xf32>
    %c1_i32 = arith.constant 1 : i32
    %52 = vector.broadcast %c1_i32 : i32 to vector<8x1xi32>
    %53 = arith.andi %48, %52 : vector<8x1xi32>
    %c0_i32 = arith.constant 0 : i32
    %54 = vector.broadcast %c0_i32 : i32 to vector<8x1xi32>
    %55 = arith.cmpi ne, %53, %54 : vector<8x1xi32>
    %56 = vector.shape_cast %55 : vector<8x1xi1> to vector<8x1xi1>
    %57 = vector.broadcast %56 : vector<8x1xi1> to vector<8x15xi1>
    %58 = arith.select %57, %51, %45 : vector<8x15xi1>, vector<8x15xf32>
    %59 = vector.extract_strided_slice %58 {offsets = [0, 2], sizes = [8, 13], strides = [1, 1]} : vector<8x15xf32> to vector<8x13xf32>
    %60 = vector.extract_strided_slice %58 {offsets = [0, 0], sizes = [8, 2], strides = [1, 1]} : vector<8x15xf32> to vector<8x2xf32>
    %61 = tpu.concatenate %59, %60 in 1 : vector<8x13xf32>, vector<8x2xf32> -> vector<8x15xf32>
    %c2_i32 = arith.constant 2 : i32
    %62 = vector.broadcast %c2_i32 : i32 to vector<8x1xi32>
    %63 = arith.andi %48, %62 : vector<8x1xi32>
    %c0_i32_38 = arith.constant 0 : i32
    %64 = vector.broadcast %c0_i32_38 : i32 to vector<8x1xi32>
    %65 = arith.cmpi ne, %63, %64 : vector<8x1xi32>
    %66 = vector.shape_cast %65 : vector<8x1xi1> to vector<8x1xi1>
    %67 = vector.broadcast %66 : vector<8x1xi1> to vector<8x15xi1>
    %68 = arith.select %67, %61, %58 : vector<8x15xi1>, vector<8x15xf32>
    %69 = vector.extract_strided_slice %68 {offsets = [0, 4], sizes = [8, 11], strides = [1, 1]} : vector<8x15xf32> to vector<8x11xf32>
    %70 = vector.extract_strided_slice %68 {offsets = [0, 0], sizes = [8, 4], strides = [1, 1]} : vector<8x15xf32> to vector<8x4xf32>
    %71 = tpu.concatenate %69, %70 in 1 : vector<8x11xf32>, vector<8x4xf32> -> vector<8x15xf32>
    %c4_i32 = arith.constant 4 : i32
    %72 = vector.broadcast %c4_i32 : i32 to vector<8x1xi32>
    %73 = arith.andi %48, %72 : vector<8x1xi32>
    %c0_i32_39 = arith.constant 0 : i32
    %74 = vector.broadcast %c0_i32_39 : i32 to vector<8x1xi32>
    %75 = arith.cmpi ne, %73, %74 : vector<8x1xi32>
    %76 = vector.shape_cast %75 : vector<8x1xi1> to vector<8x1xi1>
    %77 = vector.broadcast %76 : vector<8x1xi1> to vector<8x15xi1>
    %78 = arith.select %77, %71, %68 : vector<8x15xi1>, vector<8x15xf32>
    %79 = vector.extract_strided_slice %78 {offsets = [0, 0], sizes = [8, 8], strides = [1, 1]} : vector<8x15xf32> to vector<8x8xf32>
    %80 = arith.addf %44, %79 : vector<8x8xf32>
    %c0_40 = arith.constant 0 : index
    %c0_41 = arith.constant 0 : index
    %c0_42 = arith.constant 0 : index
    %81 = vector.load %arg13[%c0_40, %c0_41, %c0_42] : memref<1x1x8xf32, #tpu.memory_space<vmem>>, vector<1x1x8xf32>
    %82 = vector.shape_cast %81 : vector<1x1x8xf32> to vector<1x8xf32>
    %cst_43 = arith.constant 5.000000e-01 : f32
    %83 = vector.broadcast %cst_43 : f32 to vector<1x8xf32>
    %84 = arith.cmpf ogt, %82, %83 : vector<1x8xf32>
    %cst_44 = arith.constant -1.000000e+04 : f32
    %85 = vector.shape_cast %84 : vector<1x8xi1> to vector<1x8xi1>
    %86 = vector.broadcast %85 : vector<1x8xi1> to vector<8x8xi1>
    %87 = vector.broadcast %cst_44 : f32 to vector<8x8xf32>
    %88 = arith.select %86, %87, %80 : vector<8x8xi1>, vector<8x8xf32>
    %cst_45 = arith.constant dense<0xFF800000> : vector<8xf32>
    %89 = vector.multi_reduction <maximumf>, %88, %cst_45 [1] : vector<8x8xf32> to vector<8xf32>
    %90 = vector.shape_cast %89 : vector<8xf32> to vector<8x1xf32>
    %91 = vector.broadcast %90 : vector<8x1xf32> to vector<8x8xf32>
    %92 = arith.subf %88, %91 : vector<8x8xf32>
    %93 = math.exp %92 : vector<8x8xf32>
    %cst_46 = arith.constant dense<0.000000e+00> : vector<8xf32>
    %94 = vector.multi_reduction <add>, %93, %cst_46 [1] : vector<8x8xf32> to vector<8xf32>
    %95 = vector.shape_cast %94 : vector<8xf32> to vector<8x1xf32>
    %96 = tpu.reciprocal %95 {approx = true} : vector<8x1xf32> -> vector<8x1xf32>
    %97 = vector.broadcast %96 : vector<8x1xf32> to vector<8x8xf32>
    %98 = arith.mulf %93, %97 : vector<8x8xf32>
    %cst_47 = arith.constant 0.000000e+00 : f32
    %99 = vector.shape_cast %84 : vector<1x8xi1> to vector<1x8xi1>
    %100 = vector.broadcast %99 : vector<1x8xi1> to vector<8x8xi1>
    %101 = vector.broadcast %cst_47 : f32 to vector<8x8xf32>
    %102 = arith.select %100, %101, %98 : vector<8x8xi1>, vector<8x8xf32>
    %103 = arith.truncf %102 : vector<8x8xf32> to vector<8x8xbf16>
    %cst_48 = arith.constant dense<0.000000e+00> : vector<8x8xf32>
    %104 = tpu.matmul %103, %42, %cst_48 {dimension_numbers = #tpu.dot_dimension_numbers<[1], [0], [0], [1], [0, 0, 1, 1], [], []>} : vector<8x8xbf16>, vector<8x8xbf16>, vector<8x8xf32> -> vector<8x8xf32>
    %105 = arith.truncf %104 : vector<8x8xf32> to vector<8x8xbf16>
    %c0_49 = arith.constant 0 : index
    %c0_50 = arith.constant 0 : index
    %c0_51 = arith.constant 0 : index
    %c0_52 = arith.constant 0 : index
    %106 = vector.load %arg14[%c0_49, %c0_50, %c0_51, %c0_52] : memref<1x1x8x8xbf16, #tpu.memory_space<vmem>>, vector<1x1x8x8xbf16>
    %107 = vector.shape_cast %106 : vector<1x1x8x8xbf16> to vector<8x8xbf16>
    %108 = vector.shape_cast %105 : vector<8x8xbf16> to vector<1x1x8x8xbf16>
    tpu.vector_store %arg14[%c0_49, %c0_50, %c0_51, %c0_52], %108 {strides = array<i32>} : memref<1x1x8x8xbf16, #tpu.memory_space<vmem>>, vector<1x1x8x8xbf16>,
    return
  }
  func.func @transform_0(%arg0: i32, %arg1: i32) -> (i32, i32, i32) {
    %c0_i32 = arith.constant 0 : i32
    %c0_i32_0 = arith.constant 0 : i32
    %c0_i32_1 = arith.constant 0 : i32
    return %arg0, %c0_i32, %c0_i32_0 : i32, i32, i32
  }
  func.func @transform_1(%arg0: i32, %arg1: i32) -> (i32, i32) {
    %c0_i32 = arith.constant 0 : i32
    %c0_i32_0 = arith.constant 0 : i32
    %c0_i32_1 = arith.constant 0 : i32
    return %c0_i32, %c0_i32_0 : i32, i32
  }
  func.func @transform_2(%arg0: i32, %arg1: i32) -> (i32, i32, i32) {
    %c0_i32 = arith.constant 0 : i32
    %c0_i32_0 = arith.constant 0 : i32
    %c0_i32_1 = arith.constant 0 : i32
    return %arg1, %c0_i32, %c0_i32_0 : i32, i32, i32
  }
  func.func @transform_3(%arg0: i32, %arg1: i32) -> (i32, i32, i32) {
    %c0_i32 = arith.constant 0 : i32
    %c0_i32_0 = arith.constant 0 : i32
    %c0_i32_1 = arith.constant 0 : i32
    return %arg1, %c0_i32, %c0_i32_0 : i32, i32, i32
  }
  func.func @transform_4(%arg0: i32, %arg1: i32) -> (i32, i32, i32) {
    %c0_i32 = arith.constant 0 : i32
    %c0_i32_0 = arith.constant 0 : i32
    %c0_i32_1 = arith.constant 0 : i32
    return %arg1, %c0_i32, %c0_i32_0 : i32, i32, i32
  }
  func.func @transform_5(%arg0: i32, %arg1: i32) -> (i32, i32, i32) {
    %c0_i32 = arith.constant 0 : i32
    %c0_i32_0 = arith.constant 0 : i32
    %c0_i32_1 = arith.constant 0 : i32
    return %arg1, %c0_i32, %c0_i32_0 : i32, i32, i32
  }
  func.func @transform_6(%arg0: i32, %arg1: i32) -> (i32, i32, i32) {
    %c0_i32 = arith.constant 0 : i32
    %c0_i32_0 = arith.constant 0 : i32
    %c0_i32_1 = arith.constant 0 : i32
    return %arg1, %c0_i32, %c0_i32_0 : i32, i32, i32
  }
  func.func @transform_7(%arg0: i32, %arg1: i32) -> (i32, i32, i32) {
    %c0_i32 = arith.constant 0 : i32
    %c0_i32_0 = arith.constant 0 : i32
    %c0_i32_1 = arith.constant 0 : i32
    return %arg1, %c0_i32, %c0_i32_0 : i32, i32, i32
  }
  func.func @transform_8(%arg0: i32, %arg1: i32) -> (i32, i32, i32) {
    %c0_i32 = arith.constant 0 : i32
    %c0_i32_0 = arith.constant 0 : i32
    %c0_i32_1 = arith.constant 0 : i32
    return %arg1, %c0_i32, %c0_i32_0 : i32, i32, i32
  }
  func.func @transform_9(%arg0: i32, %arg1: i32) -> (i32, i32, i32) {
    %c0_i32 = arith.constant 0 : i32
    %c0_i32_0 = arith.constant 0 : i32
    %c0_i32_1 = arith.constant 0 : i32
    return %arg1, %c0_i32, %c0_i32_0 : i32, i32, i32
  }
  func.func @transform_10(%arg0: i32, %arg1: i32) -> (i32, i32, i32) {
    %c0_i32 = arith.constant 0 : i32
    %c0_i32_0 = arith.constant 0 : i32
    %c0_i32_1 = arith.constant 0 : i32
    return %arg1, %c0_i32, %c0_i32_0 : i32, i32, i32
  }
  func.func @transform_11(%arg0: i32, %arg1: i32) -> (i32, i32, i32) {
    %c0_i32 = arith.constant 0 : i32
    %c0_i32_0 = arith.constant 0 : i32
    %c0_i32_1 = arith.constant 0 : i32
    return %arg0, %c0_i32, %c0_i32_0 : i32, i32, i32
  }
  func.func @transform_12(%arg0: i32, %arg1: i32) -> (i32, i32, i32, i32) {
    %c0_i32 = arith.constant 0 : i32
    %c0_i32_0 = arith.constant 0 : i32
    %c0_i32_1 = arith.constant 0 : i32
    return %arg0, %arg1, %c0_i32, %c0_i32_0 : i32, i32, i32, i32
  }
}

</mosaic_0001>

<bundles_post_ra>
// kernel: tpu_custom_call.1
= control target key start
LH: loop header
LB: loop body
LE: loop exit
PB: predicated region body
PF: predicated region fallthrough
CT: control target
= control target key end

     0   :  { %s1595_s0 = inlined_call_operand.vmem [shape: bf16[2,8,32], index: 0, kind: input, shape index: {}]   ;;  %s1596_s1 = inlined_call_operand.vmem [shape: bf16[15,32], index: 1, kind: input, shape index: {}]   ;;  %s1597_s2 = inlined_call_operand.vmem [shape: bf16[4,32,8], index: 2, kind: input, shape index: {}]   ;;  %s1598_s3 = inlined_call_operand.vmem [shape: f32[4,1,8], index: 3, kind: input, shape index: {}]   ;;  %s1599_s4 = inlined_call_operand.vmem [shape: bf16[4,32,8], index: 4, kind: input, shape index: {}]   ;;  %s1600_s5 = inlined_call_operand.vmem [shape: f32[4,1,8], index: 5, kind: input, shape index: {}]   ;;  %s1601_s6 = inlined_call_operand.vmem [shape: bf16[4,32,8], index: 6, kind: input, shape index: {}]   ;;  %s1602_s7 = inlined_call_operand.vmem [shape: f32[4,1,8], index: 7, kind: input, shape index: {}]   ;;  %s1603_s8 = inlined_call_operand.vmem [shape: bf16[4,32,8], index: 8, kind: input, shape index: {}]   ;;  %s1604_s9 = inlined_call_operand.vmem [shape: f32[4,1,8], index: 9, kind: input, shape index: {}]   ;;  %s1605_s10 = inlined_call_operand.vmem [shape: f32[4,1,8], index: 10, kind: input, shape index: {}]   ;;  %s1606_s11 = inlined_call_operand.vmem [shape: f32[2,1,8], index: 11, kind: input, shape index: {}]   ;;  %s1607_s12 = inlined_call_operand.hbm [shape: bf16[2,4,8,8], index: 12, kind: output, shape index: {}]  }
   0x1   :  { %1615 = sst [smem:[#allocation13_spill]] %s1599_s4 }
   0x2   :  { %17 = vsyncpa [#allocation3], 0 }
   0x3   :  { %19 = vsyncpa [#allocation3 + $0x1], 0  ;;  %s1398_s21 = smov 0   ;;  %s1400_s22 = smov 0  }
   0x4   :  { %s1402_s23 = smov 0   ;;  %s1404_s24 = smov 0  }
   0x5   :  { %s1406_s25 = smov 0   ;;  %s1408_s26 = smov 0  }
   0x6   :  { %s1410_s27 = smov 0   ;;  %s1412_s28 = smov 0  }
   0x7 LB: > { %1616 = sst [smem:[#allocation5_spill]] %s1296_s21  ;;  %s1067_s29 = sadd.s32 4294967295, %s1324_s28   ;;  %s1324_s28 = sphi %s1412_s28, %s25_s28   ;;  %s1320_s27 = sphi %s1410_s27, %s1636_s27   ;;  %s1316_s26 = sphi %s1408_s26, %s1635_s26   ;;  %s1312_s25 = sphi %s1406_s25, %s1634_s25   ;;  %s1308_s24 = sphi %s1404_s24, %s1633_s24   ;;  %s1304_s23 = sphi %s1402_s23, %s1632_s23   ;;  %s1300_s22 = sphi %s1400_s22, %s1638_s22   ;;  %s1296_s21 = sphi %s1398_s21, %s1637_s21  }
   0x8   : > { %1617 = sst [smem:[#allocation6_spill]] %s1304_s23  ;;  %s1068_s30 = sadd.s32 4294967294, %s1324_s28  }
   0x9   : > { %1618 = sst [smem:[#allocation7_spill]] %s1316_s26  ;;  %s34_s13 = sadd.s32 1, %s1316_s26 }
   0xa   : > { %1619 = sst [smem:[#allocation8_spill]] %s1320_s27  ;;  %p35_p0 = scmp.ge.s32.totalorder %s34_s13, 4 }
   0xb   : > { %s37_s14 = sadd.s32 1, %s1320_s27  ;;  %p363_p1 = scmp.ne.s32.totalorder %s1304_s23, %s1300_s22 }
   0xc   : > { %p364_p2 = scmp.eq.s32.totalorder %s1067_s29, 7  ;;  %s1640_s13 = smov (%p35_p0, %s34_s13), 0 }
   0xd   : > { %1620 = sst [smem:[#allocation9_spill]] %s1640_s13  ;;  %s1642_s14 = smov (!%p35_p0, %s37_s14), %s1320_s27 }
   0xe   : > { %s349_s15 = ssub.s32 %s1316_s26, %s1640_s13  ;;  %p1449_p3 = por %p364_p2, %p363_p1 }
   0xf   : > { %p39_p4 = scmp.ge.s32.totalorder %s1642_s14, 2  ;;  %p369_p5 = scmp.ne.s32.totalorder %s1300_s22, %s1296_s21 }
  0x10   : > { %p370_p6 = scmp.eq.s32.totalorder %s1068_s30, 7  ;;  %p1071_p7 = scmp.ge.s32.totalorder %s1324_s28, 1 }
  0x11   : > { %s1644_s14 = smov (%p39_p4, %s1642_s14), 0  ;;  %p466_p9 = scmp.lt.s32.totalorder %s1324_s28, 9 }
  0x12   : > { %1622 = sst [smem:[#allocation10_spill]] %s1644_s14  ;;  %p1458_p8 = por %p370_p6, %p369_p5 }
  0x13   : > { %s348_s18 = ssub.s32 %s1320_s27, %s1644_s14  ;;  %s353_s19 = sadd.s32 1, %s1304_s23 }
  0x14   : > { %s1623_s17 = scalar_select %p1458_p8, 1, 0 }
  0x15   : > { %s350_s20 = sor.u32 %s349_s15, %s348_s18  ;;  %p467_p10 = pnand %p1071_p7, %p466_p9 }
  0x16   : > { %1624 = sst [smem:[#allocation11_spill]] %s1623_s17  ;;  %p351_p11 = scmp.eq.s32.totalorder %s350_s20, 0 }
  0x17   : > { %470 = sbr.rel (%p467_p10) target bundleno = 1067 (0x42b), region = 68  ;;  %p549_p12 = scmp.lt.s32.totalorder (!%p467_p10), %s1308_s24, 3 }
  0x18   : > { %s1467_s29 = scalar_select %p351_p11, %s1304_s23, %s353_s19  }
  0x19   : > { %p545_p13 = scmp.lt.s32.totalorder (!%p467_p10), %s1312_s25, 1  ;;  %s1626_s4 = sld [smem:[#allocation13_spill]] (!%p467_p10) }
  0x1a   : > { %1625 = sst [smem:[#allocation12_spill]] %s1467_s29  ;;  %s1326_s29 = smov (!%p467_p10), 127  }
  0x1c   : > { %s1472_s30 = scalar_select %p549_p12, %s1308_s24, 3  ;;  %v1134_v6 = vld [vmem:[%s1596_s1] sm:$0xff]  ;;  %vm611_vm0 = vcmask 261120   ;;  %vm749_vm1 = vcmask 64512   ;;  %v769_v34 = vlaneseq  ;;  %vm779_vm2 = vcmask 113664  }
  0x1d   : > { %s1475_s13 = scalar_select %p545_p13, %s1312_s25, 1  ;;  %vm793_vm4 = vcmask 105472   ;;  %v1332_v52 = vmov 0   ;;  %vm807_vm7 = vcmask 89088   ;;  %vm855_vm10 = vcmask 1043456  }
  0x1e   : > { %s1478_s14 = sshll.u32 %s1472_s30, 4  ;;  %s580_s15 = scalar_lea.vmem %s1604_s9, %s1472_s30  ;;  %v770_v35 = vshrl.u32 %v769_v34, 7  ;;  %vm873_vm11 = vcmask 60416  }
  0x1f   : > { %s577_s19 = scalar_lea.vmem %s1603_s8, %s1478_s14  ;;  %s561_s26 = scalar_lea.vmem %s1626_s4, %s1478_s14  ;;  %v1223_v11 = vld [vmem:[%s580_s15] ss:$0 sm:$0xff] }
  0x20   : > { %v1142_v0 = vld [vmem:[%s577_s19 + $0x8] sm:$0xff]  ;;  %s553_s17 = scalar_lea.vmem %s1597_s2, %s1478_s14  ;;  %s1073_s21 = sshll.u32 %s1475_s13, 2  ;;  %v1141_v3 = vld [vmem:[%s577_s19] sm:$0xff]  ;;  %v771_v36 = vsub.s32 7, %v770_v35 }
  0x21   : > { %v1138_v1 = vld [vmem:[%s561_s26 + $0x8] sm:$0xff]  ;;  %724 = vmatpush.bf16.msra.mxu3 %v1142_v0  ;;  %v1137_v4 = vld [vmem:[%s561_s26] sm:$0xff]  ;;  %s548_s18 = scalar_lea.vmem %s1595_s0, %s1073_s21  ;;  %s564_s26 = scalar_lea.vmem %s1600_s5, %s1472_s30 }
  0x22   : > { %v1136_v2 = vld [vmem:[%s553_s17 + $0x8] sm:$0xff]  ;;  %654 = vmatpush.bf16.msra.mxu1 %v1138_v1  ;;  %v1135_v5 = vld [vmem:[%s553_s17] sm:$0xff]  ;;  %s556_s17 = scalar_lea.vmem %s1598_s3, %s1472_s30  ;;  %s583_s23 = scalar_lea.vmem %s1605_s10, %s1472_s30  ;;  %v781_v38 = vand.u32 1, %v771_v36  ;;  %v795_v43 = vand.u32 2, %v771_v36  ;;  %v809_v51 = vand.u32 4, %v771_v36 }
  0x23   : > { %621 = vmatpush.bf16.msra.mxu0 %v1136_v2  ;;  %v1499_v7 = vld [vmem:[%s548_s18] sm:$0xf]  ;;  %s1328_s4 = smov 126   ;;  %s1329_s21 = smov 13  }
  0x24   : > { %v1221_v8 = vld [vmem:[%s564_s26] ss:$0 sm:$0xff]  ;;  %s1327_s26 = smov 14   ;;  %vm782_vm3 = vcmp.ne.s32.totalorder %v781_v38, 0  ;;  %vm796_vm5 = vcmp.ne.s32.totalorder %v795_v43, 0  ;;  %s1331_s19 = smov 11  }
  0x25   : > { %725 = vmatpush.bf16.msra.mxu3 %v1141_v3  ;;  %v1222_v9 = vld [vmem:[%s556_s17] ss:$0 sm:$0xff]  ;;  %s1330_s17 = smov 124   ;;  %s569_s18 = scalar_lea.vmem %s1601_s6, %s1478_s14  ;;  %vm810_vm8 = vcmp.ne.s32.totalorder %v809_v51, 0 }
  0x26   : > { %655 = vmatpush.bf16.msra.mxu1 %v1137_v4  ;;  %v1224_v22 = vld [vmem:[%s583_s23] ss:$0 sm:$0xff]  ;;  %v1140_v47 = vld [vmem:[%s569_s18 + $0x8] sm:$0xff] }
  0x27   : > { %622 = vmatpush.bf16.msra.mxu0 %v1135_v5  ;;  %687 = vmatpush.bf16.msra.mxu2 %v1140_v47  ;;  %v1139_v48 = vld [vmem:[%s569_s18] sm:$0xff] }
  0x28   : > { %1121 = vmatmul.msk.bf16.vlgmr.msra.gmra.mxu3 %vm611_vm0, %v1134_v6 }
  0x29   : > { %1099 = vmatmul.msk.bf16.vlgmr.msra.gmra.mxu1 %vm611_vm0, %v1499_v7 }
  0x2a   : > { %1090 = vmatmul.msk.bf16.vlgmr.msra.gmra.mxu0 %vm611_vm0, %v1499_v7 }
  0x2b   : > { %688 = vmatpush.bf16.msra.mxu2 %v1139_v48 }
  0x2e   : > { %1108 = vmatmul.msk.bf16.vlgmr.msra.gmra.mxu2 %vm611_vm0, %v1499_v7 }
  0xa6   : > { %v657_v10 = vpop.f32.mrf.mxu1 }
  0xa7   : > { %v658_v12 = vadd.f32 %v1221_v8, %v657_v10  ;;  %v624_v13 = vpop.f32.mrf.mxu0 }
  0xa8   : > { %v625_v14 = vadd.f32 %v1222_v9, %v624_v13 }
  0xa9   : > { %v746_v15 = vpack.c.bf16 %v658_v12, %v658_v12 }
  0xaa   : > { %v736_v16 = vadd.f32 %v1223_v11, %v625_v14  ;;  %v743_v24 = vadd.f32 %v1224_v22, %v625_v14 }
  0xab   : > { %v818_v17 = vsel %vm749_vm1, %v746_v15, 0  ;;  %v727_v18 = vpop.f32.mrf.mxu3 }
  0xac   : > { %v737_v19 = vmul.f32 0.35355338, %v736_v16  ;;  %827 = vmatpush.bf16.xpose.msrb.mxu1 %v818_v17  ;;  %v744_v27 = vmul.f32 0.35355338, %v743_v24 }
  0xae   : > { %v659_v20 = vpop.f32.mrf.mxu1  ;;  %v738_v21 = vpack.c.bf16 %v737_v19, %v737_v19  ;;  %v745_v29 = vpack.c.bf16 %v744_v27, %v744_v27 }
  0xaf   : > { %v626_v23 = vpop.f32.mrf.mxu0 }
  0xb1   : > { %v690_v62 = vpop.f32.mrf.mxu2 }
  0xb3   : > { %1123 = vmatmul.msk.bf16.vlgmr.msrb.gmra.mxu1 %vm749_vm1, %v738_v21  ;;  %v729_v25 = vpop.f32.mrf.mxu3 }
  0xb4   : > { %v748_v26 = vpack.c.bf16 %v729_v25, %v727_v18 }
  0xb6   : > { %v754_v28 = vsel %vm749_vm1, %v748_v26, 0 }
  0xb7   : > { %763 = vmatpush.bf16.xpose.msrb.mxu0 %v754_v28 }
  0xb9   : > { %v692_v1 = vpop.f32.mrf.mxu2 }
  0xbe   : > { %1122 = vmatmul.msk.bf16.vlgmr.msrb.gmra.mxu0 %vm749_vm1, %v745_v29 }
 0x130   : > { %v829_v30 = vpop.f32.mrf.mxu1 }
 0x138   : > { %v831_v31 = vpop.f32.mrf.mxu1 }
 0x13b   : > { %v765_v32 = vpop.f32.mrf.mxu0 }
 0x13c   : > { %773 = vrot.lane.b32.xlu0 %v765_v32, %s1326_s29  ;;  %s586_s29 = scalar_lea.vmem %s1606_s11, %s1475_s13 }
 0x13d   : > { %v833_v49 = vld [vmem:[%s586_s29] sm:$0x1] }
 0x13e   : > { %vm834_vm6 = vcmp.gt.f32.partialorder %v833_v49, 0.5 }
 0x13f   : > { %v835_v53 = vsel %vm834_vm6, 1, %v1332_v52 }
 0x140   : > { %v836_v54 = vperm.slane %v835_v53, 0 }
 0x142   : > { %vm1536_vm9 = vcmp.eq.s32.totalorder %v836_v54, 1 }
 0x143   : > { %v767_v33 = vpop.f32.mrf.mxu0 }
 0x144   : > { %776 = vrot.lane.b32.xlu0 %v765_v32, %s1327_s26  ;;  %s572_s26 = scalar_lea.vmem %s1602_s7, %s1472_s30  ;;  %s1126_s30 = sshll.u32 %s1312_s25, 2 }
 0x145   : > { %v1225_v5 = vld [vmem:[%s572_s26] ss:$0 sm:$0xff] }
 0x146   : > { %v691_v6 = vadd.f32 %v1225_v5, %v690_v62 }
 0x148   : > { %v747_v7 = vpack.c.bf16 %v691_v6, %v691_v6 }
 0x14a   : > { %v857_v8 = vsel %vm855_vm10, %v747_v7, 0 }
 0x14b   : > { %866 = vmatpush.bf16.msrb.mxu2 %v857_v8 }
 0x1ae   : > { %v774_v37 = vpop.permute.xlu0 %773 }
 0x1b6   : > { %v777_v39 = vpop.permute.xlu0 %776 }
 0x1b7   : > { %v780_v40 = vsel %vm779_vm2, %v774_v37, %v777_v39 }
 0x1b8   : > { %v785_v41 = vsel %vm782_vm3, %v780_v40, %v765_v32 }
 0x1b9   : > { %787 = vrot.lane.b32.xlu1 %v785_v41, %s1328_s4  ;;  %s886_s4 = sadd.s32 %s1308_s24, %s1126_s30  ;;  %s1250_s30 = scalar_lea.hbm %s1607_s12, 32 }
 0x1c1   : > { %790 = vrot.lane.b32.xlu1 %v785_v41, %s1329_s21  ;;  %s542_s21 = sand.u32 1, %s1300_s22  }
 0x1c2   : > { %s876_s13 = scalar_lea.sflag [#allocation3], %s542_s21 }
 0x22b   : > { %v788_v42 = vpop.permute.xlu1 %787 }
 0x233   : > { %v791_v44 = vpop.permute.xlu1 %790 }
 0x234   : > { %v794_v45 = vsel %vm793_vm4, %v788_v42, %v791_v44 }
 0x235   : > { %v799_v46 = vsel %vm796_vm5, %v794_v45, %v785_v41 }
 0x236   : > { %801 = vrot.lane.b32.xlu2 %v799_v46, %s1330_s17  ;;  %s1127_s17 = sshll.u32 %s886_s4, 2 }
 0x237   : > { %s888_s18 = scalar_lea.hbm %s1607_s12, %s1127_s17 }
 0x238   : > { %s892_s29 = sshll.u32 %s888_s18, 4  ;;  %s893_s29 = int_to_ptr.hbm [resolvable:$true] %s892_s29 }
 0x239   : > { %s1244_s25 = sshra.s32 %s893_s29, 4  ;;  %s1245_s25 = int_to_ptr.hbm [resolvable:$true] %s1244_s25 }
 0x23a   : > { %s1246_s24 = scalar_lea.hbm %s1245_s25, 4  ;;  %p1251_p4 = scmp.lt.s32.totalorder %s1245_s25, %s1607_s12 }
 0x23b   : > { %p1247_p0 = scmp.ne.s32.totalorder %s1245_s25, %s1246_s24  ;;  %p1252_p5 = scmp.lt.s32.totalorder %s1250_s30, %s1246_s24 }
 0x23d   : > { %p1248_p1 = pnand %p1247_p0, %p1449_p3  ;;  %p1253_p6 = por %p1252_p5, %p1251_p4 }
 0x23e   : > { %804 = vrot.lane.b32.xlu2 %v799_v46, %s1331_s19  ;;  %s1072_s19 = sshll.u32 %s542_s21, 2 }
 0x23f   : > { %s544_s20 = scalar_lea.vmem [#allocation2], %s1072_s19  ;;  %p1249_p2 = pneg %p1248_p1 }
 0x240   : > { %s890_s23 = sshll.u32 %s544_s20, 4  ;;  %s891_s23 = int_to_ptr.vmem [resolvable:$true] %s890_s23 }
 0x241   : > { %p1254_p7 = pnand %p1253_p6, %p1249_p2 }
 0x290   : > { %v802_v50 = vpop.permute.xlu2 %801 }
 0x298   : > { %v805_v55 = vpop.permute.xlu2 %804 }
 0x299   : > { %v808_v56 = vsel %vm807_vm7, %v802_v50, %v805_v55 }
 0x29a   : > { %v813_v57 = vsel %vm810_vm8, %v808_v56, %v799_v46 }
 0x29b   : > { %v830_v59 = vadd.f32 %v829_v30, %v813_v57 }
 0x29d   : > { %v838_v60 = vsel %vm1536_vm9, -10000.0, %v830_v59 }
 0x29e   : > { %v839_v61 = vsel %vm749_vm1, %v838_v60, -inf }
 0x29f   : > { %840 = vmax.xlane.f32.xlu0 %v839_v61 }
 0x312   : > { %v841_v63 = vpop.xlane.xlu0 %840 }
 0x313   : > { %v842_v0 = vsub.f32 %v838_v60, %v841_v63 }
 0x315   : > { %v843_v2 = vmul.f32 1.442695, %v842_v0 }
 0x317   : > { %1226 = vpow2.f32 %v843_v2 }
 0x31d   : > { %v1227_v3 = vpop.eup %1226 }
 0x31e   : > { %v845_v4 = vsel %vm749_vm1, %v1227_v3, 0.0 }
 0x31f   : > { %846 = vadd.xlane.f32.xlu1 %v845_v4 }
 0x392   : > { %v847_v9 = vpop.xlane.xlu1 %846 }
 0x393   : > { %1228 = vrcp.f32 %v847_v9 }
 0x399   : > { %v1229_v10 = vpop.eup %1228 }
 0x39a   : > { %v849_v11 = vmul.f32 %v1229_v10, %v1227_v3 }
 0x39c   : > { %v850_v12 = vsel %vm1536_vm9, 0.0, %v849_v11 }
 0x39d   : > { %v851_v13 = vpack.c.bf16 %v850_v12, %v850_v12 }
 0x39f   : > { %1124 = vmatmul.msk.bf16.vlgmr.msrb.gmra.mxu2 %vm749_vm1, %v851_v13 }
 0x422   : > { %v868_v14 = vpop.f32.mrf.mxu2 }
 0x423   : > { %v872_v15 = vpack.c.bf16 %v868_v14, %v868_v14 }
 0x425   : > { %874 = vst.msk [vmem:[%s544_s20] sm:$0xf] %vm873_vm11, %v872_v15 }
 0x426   : > { %1257 = shalt.err (!%p1254_p7)
}
 0x427   : > { %1143 = dma.vmem_to_hbm [thread:$0]  (%p1449_p3), %s891_s23, 64, %s893_s29, %s876_s13  }
 0x42a   : > { %v870_v16 = vpop.f32.mrf.mxu2 }
 0x42b PF: > { %s1629_s21 = sld [smem:[#allocation5_spill]]  ;;  %p1149_p9 = scmp.ge.s32.totalorder %s1324_s28, 2 }
 0x42d   : > { %p1146_p10 = pnand %p1149_p9, %p1458_p8 }
 0x42f   : > { %p1147_p11 = pneg %p1146_p10 }
 0x431   : > { %s904_s27 = sand.u32 1, %s1629_s21  }
 0x432   : > { %s905_s15 = scalar_lea.sflag [#allocation3], %s904_s27 }
 0x433   : > { %1291 = dma.done.wait (%p1147_p11), %s905_s15, 64  }
 0x434   : > { %1293 = vsyncadd (%p1147_p11), %s905_s15, 4294967232  ;;  %s25_s28 = sadd.s32 1, %s1324_s28   ;;  %s1631_s18 = sld [smem:[#allocation6_spill]] }
 0x435   : > { %p22_p12 = scmp.ge.s32.totalorder %s25_s28, 10   ;;  %s1632_s23 = sld [smem:[#allocation12_spill]] }
 0x436   : > { %s1633_s24 = sld [smem:[#allocation7_spill]]  ;;  %s1637_s21 = smov %s1300_s22 }
 0x437   : > { %s1634_s25 = sld [smem:[#allocation8_spill]]  ;;  %24 = sbr.rel (!%p22_p12) target bundleno = 7 (0x7), region = 133 }
 0x438   : > { %s1635_s26 = sld [smem:[#allocation9_spill]] }
 0x439   : > { %s1636_s27 = sld [smem:[#allocation10_spill]] }
 0x43a   : > { %s1638_s22 = smov %s1631_s18 }
 0x43c   :  { %911 = vsyncpa [#allocation3], 1 }
 0x43d   :  { %913 = vsyncpa [#allocation3 + $0x1], 1 }

</bundles_post_ra>
